<compile_context>
chip_gen: v6e
topology: v6e:2x2x1
jax: 0.10.0
libtpu: 0.0.40
codegen_flags: <defaults>
</compile_context>

<pallas_src>
import functools

import jax
import jax.numpy as jnp
from jax import lax
from jax.experimental import pallas as pl
from jax.experimental.pallas import tpu as pltpu


def _round_up(x, m):
    return ((x + m - 1) // m) * m


def _linear_logsoftmax_kernel(x_ref, w_ref, b_ref, o_ref):
    # x_ref: (tm, d_model)  w_ref: (vocab_p, d_model)  b_ref: (1, vocab_p) f32
    # Contraction is d_model vs d_model (x @ w.T) -> no host-side transpose;
    # accumulate in f32 on the MXU.
    logits = lax.dot_general(
        x_ref[...], w_ref[...],
        dimension_numbers=(((1,), (1,)), ((), ())),
        preferred_element_type=jnp.float32,
    ) + b_ref[...]
    # Numerically stable log-softmax along the last (vocab / lane) axis, in f32.
    m = jnp.max(logits, axis=-1, keepdims=True)
    shifted = logits - m
    lse = jnp.log(jnp.sum(jnp.exp(shifted), axis=-1, keepdims=True))
    o_ref[...] = (shifted - lse).astype(o_ref.dtype)


_VMEM_BUDGET = 40 * 1024 * 1024   # keeps headroom on v7x's 64 MiB VMEM
_VMEM_LIMIT = 48 * 1024 * 1024    # above 16/32 MiB scoped defaults, safe on all gens


def _pick_tm(n, d_model, vocab_p, in_bytes, out_bytes):
    """Largest row tile (multiple of 8, <= 512) whose working set fits the budget."""
    n_rows = _round_up(max(n, 1), 8)
    # Resident weight/bias (conservatively assume Pallas double-buffers them).
    fixed = 2 * vocab_p * d_model * in_bytes + 2 * vocab_p * 4
    per_row = (2 * d_model * in_bytes        # double-buffered x tile
               + 2 * vocab_p * out_bytes     # double-buffered output tile
               + 3 * vocab_p * 4)            # f32 logits / shifted / exp temporaries
    tm = 8
    for cand in (512, 256, 128, 64, 32, 16, 8):
        if fixed + cand * per_row <= _VMEM_BUDGET:
            tm = cand
            break
    return min(tm, n_rows)


@functools.partial(jax.jit, static_argnames=("tm", "matmul_dtype"))
def linear_softmax_block(x, weight, bias, *, tm=None, matmul_dtype=None):
    """x: (batch, seq, d_model); weight: (vocab, d_model) [PyTorch layout]; bias: (vocab,).

    matmul_dtype: optionally cast x/weight (e.g. jnp.bfloat16) for the MXU fast
    path on v6e/v7x; accumulation and all softmax math remain f32.
    """
    batch, seq, d_model = x.shape
    vocab = weight.shape[0]
    n = batch * seq
    out_dtype = x.dtype

    if matmul_dtype is not None:
        x = x.astype(matmul_dtype)
        weight = weight.astype(matmul_dtype)
    bias = bias.astype(jnp.float32)

    # Lane-dense vocab: pad to a multiple of 128; padded columns get a -1e30
    # bias so exp() contributes 0 to the softmax denominator.
    vocab_p = _round_up(vocab, 128)
    if vocab_p != vocab:
        weight = jnp.pad(weight, ((0, vocab_p - vocab), (0, 0)))
        bias = jnp.pad(bias, (0, vocab_p - vocab), constant_values=-1e30)
    b2d = bias.reshape(1, vocab_p)

    in_bytes = jnp.dtype(x.dtype).itemsize
    out_bytes = jnp.dtype(out_dtype).itemsize
    if tm is None:
        tm = _pick_tm(n, d_model, vocab_p, in_bytes, out_bytes)
    tm = max(8, _round_up(tm, 8))

    # Pad rows to a multiple of tm (padded rows compute log_softmax(bias), never
    # alias valid rows, and are sliced away below).
    n_p = _round_up(n, tm)
    x2d = x.reshape(n, d_model)
    if n_p != n:
        x2d = jnp.pad(x2d, ((0, n_p - n), (0, 0)))

    cost = pl.CostEstimate(
        flops=2 * n_p * d_model * vocab_p,
        transcendentals=n_p * vocab_p,
        bytes_accessed=(n_p * d_model * in_bytes
                        + vocab_p * d_model * in_bytes
                        + vocab_p * 4
                        + n_p * vocab_p * out_bytes),
    )

    out2d = pl.pallas_call(
        _linear_logsoftmax_kernel,
        out_shape=jax.ShapeDtypeStruct((n_p, vocab_p), out_dtype),
        grid_spec=pltpu.PrefetchScalarGridSpec(
            num_scalar_prefetch=0,
            grid=(n_p // tm,),
            in_specs=[
                pl.BlockSpec((tm, d_model), lambda i: (i, 0)),
                pl.BlockSpec((vocab_p, d_model), lambda i: (0, 0)),
                pl.BlockSpec((1, vocab_p), lambda i: (0, 0)),
            ],
            out_specs=pl.BlockSpec((tm, vocab_p), lambda i: (i, 0)),
        ),
        compiler_params=pltpu.CompilerParams(
            dimension_semantics=("parallel",),
            vmem_limit_bytes=_VMEM_LIMIT,
        ),
        cost_estimate=cost,
    )(x2d, weight, b2d)

    return out2d[:n, :vocab].reshape(batch, seq, vocab)


if __name__ == "__main__":
    # Small shapes consistent with the module's forward.
    batch, seq, d_model, vocab = 2, 8, 32, 128

    key = jax.random.PRNGKey(0)
    kx, kw, kb = jax.random.split(key, 3)

    # Deterministic init mimicking nn.Linear: U(-1/sqrt(d_model), 1/sqrt(d_model))
    bound = 1.0 / (d_model ** 0.5)
    weight = jax.random.uniform(kw, (vocab, d_model), jnp.float32, -bound, bound)
    bias = jax.random.uniform(kb, (vocab,), jnp.float32, -bound, bound)
    x = jax.random.normal(kx, (batch, seq, d_model), jnp.float32)

    ref = jax.nn.log_softmax(x @ weight.T + bias, axis=-1)

    # f32 path: exact-ish
    out = jax.block_until_ready(linear_softmax_block(x, weight, bias))
    assert out.shape == (batch, seq, vocab)
    assert jnp.allclose(out, ref, atol=1e-5, rtol=1e-5)

    # bf16-matmul path (v6e/v7x MXU fast path): looser tolerance, f32 softmax math
    out_bf16 = jax.block_until_ready(
        linear_softmax_block(x, weight, bias, matmul_dtype=jnp.bfloat16))
    assert out_bf16.shape == (batch, seq, vocab)
    assert jnp.allclose(out_bf16, ref, atol=5e-2, rtol=5e-2)

    print("KERNEL_OK")
</pallas_src>

<mosaic_0001>
module attributes {stable_mosaic.version = 11 : i64} {
  func.func @_linear_logsoftmax_kernel(%arg0: i32, %arg1: memref<16x32xf32, #tpu.memory_space<vmem>>, %arg2: memref<128x32xf32, #tpu.memory_space<vmem>>, %arg3: memref<1x128xf32, #tpu.memory_space<vmem>>, %arg4: memref<16x128xf32, #tpu.memory_space<vmem>>) attributes {dimension_semantics = [#tpu.dimension_semantics<parallel>], iteration_bounds = array<i64: 1>, scalar_prefetch = 0 : i64, scratch_operands = 0 : i64, tpu.core_type = #tpu.core_type<tc>, window_params = [{transform_indices = @transform_0, window_bounds = array<i64: 16, 32>}, {pipeline_mode = #tpu.pipeline_mode<synchronous>, transform_indices = @transform_1, window_bounds = array<i64: 128, 32>}, {pipeline_mode = #tpu.pipeline_mode<synchronous>, transform_indices = @transform_2, window_bounds = array<i64: 1, 128>}, {transform_indices = @transform_3, window_bounds = array<i64: 16, 128>}]} {
    %c0 = arith.constant 0 : index
    %c0_0 = arith.constant 0 : index
    %0 = vector.load %arg1[%c0, %c0_0] : memref<16x32xf32, #tpu.memory_space<vmem>>, vector<16x32xf32>
    %c0_1 = arith.constant 0 : index
    %c0_2 = arith.constant 0 : index
    %1 = vector.load %arg2[%c0_1, %c0_2] : memref<128x32xf32, #tpu.memory_space<vmem>>, vector<128x32xf32>
    %cst = arith.constant dense<0.000000e+00> : vector<16x128xf32>
    %2 = tpu.matmul %0, %1, %cst {dimension_numbers = #tpu.dot_dimension_numbers<[1], [1], [0], [0], [0, 0, 1, 0], [], []>} : vector<16x32xf32>, vector<128x32xf32>, vector<16x128xf32> -> vector<16x128xf32>
    %c0_3 = arith.constant 0 : index
    %c0_4 = arith.constant 0 : index
    %3 = vector.load %arg3[%c0_3, %c0_4] : memref<1x128xf32, #tpu.memory_space<vmem>>, vector<1x128xf32>
    %4 = vector.broadcast %3 : vector<1x128xf32> to vector<16x128xf32>
    %5 = arith.addf %2, %4 : vector<16x128xf32>
    %cst_5 = arith.constant dense<0xFF800000> : vector<16xf32>
    %6 = vector.multi_reduction <maximumf>, %5, %cst_5 [1] : vector<16x128xf32> to vector<16xf32>
    %7 = vector.shape_cast %6 : vector<16xf32> to vector<16x1xf32>
    %8 = vector.broadcast %7 : vector<16x1xf32> to vector<16x128xf32>
    %9 = arith.subf %5, %8 : vector<16x128xf32>
    %10 = math.exp %9 : vector<16x128xf32>
    %cst_6 = arith.constant dense<0.000000e+00> : vector<16xf32>
    %11 = vector.multi_reduction <add>, %10, %cst_6 [1] : vector<16x128xf32> to vector<16xf32>
    %12 = vector.shape_cast %11 : vector<16xf32> to vector<16x1xf32>
    %13 = math.log %12 : vector<16x1xf32>
    %14 = vector.broadcast %13 : vector<16x1xf32> to vector<16x128xf32>
    %15 = arith.subf %9, %14 : vector<16x128xf32>
    %c0_7 = arith.constant 0 : index
    %c0_8 = arith.constant 0 : index
    %16 = vector.load %arg4[%c0_7, %c0_8] : memref<16x128xf32, #tpu.memory_space<vmem>>, vector<16x128xf32>
    tpu.vector_store %arg4[%c0_7, %c0_8], %15 {strides = array<i32>} : memref<16x128xf32, #tpu.memory_space<vmem>>, vector<16x128xf32>,
    return
  }
  func.func @transform_0(%arg0: i32) -> (i32, i32) {
    %c0_i32 = arith.constant 0 : i32
    %c0_i32_0 = arith.constant 0 : i32
    return %arg0, %c0_i32 : i32, i32
  }
  func.func @transform_1(%arg0: i32) -> (i32, i32) {
    %c0_i32 = arith.constant 0 : i32
    %c0_i32_0 = arith.constant 0 : i32
    %c0_i32_1 = arith.constant 0 : i32
    return %c0_i32, %c0_i32_0 : i32, i32
  }
  func.func @transform_2(%arg0: i32) -> (i32, i32) {
    %c0_i32 = arith.constant 0 : i32
    %c0_i32_0 = arith.constant 0 : i32
    %c0_i32_1 = arith.constant 0 : i32
    return %c0_i32, %c0_i32_0 : i32, i32
  }
  func.func @transform_3(%arg0: i32) -> (i32, i32) {
    %c0_i32 = arith.constant 0 : i32
    %c0_i32_0 = arith.constant 0 : i32
    return %arg0, %c0_i32 : i32, i32
  }
}

</mosaic_0001>

<bundles_post_ra>
// kernel: linear_softmax_block.1
= control target key start
LH: loop header
LB: loop body
LE: loop exit
PB: predicated region body
PF: predicated region fallthrough
CT: control target
= control target key end

     0   :  { %vm40_vm0 = vcmask 261120   ;;  %s430_s0 = inlined_call_operand.vmem [shape: f32[16,32], index: 0, kind: input, shape index: {}]   ;;  %s431_s1 = inlined_call_operand.vmem [shape: f32[128,32], index: 1, kind: input, shape index: {}]   ;;  %s432_s2 = inlined_call_operand.vmem [shape: f32[1,128], index: 2, kind: input, shape index: {}]   ;;  %s433_s3 = inlined_call_operand.hbm [shape: f32[16,128], index: 3, kind: output, shape index: {}]  }
   0x1   :  { %v32_v0 = vld [vmem:[%s431_s1 + $0x78] sm:$0xff]  ;;  %v31_v1 = vld [vmem:[%s431_s1 + $0x70] sm:$0xff]  ;;  %v30_v2 = vld [vmem:[%s431_s1 + $0x68] sm:$0xff] }
   0x2   :  { %245 = vmatprep.subr.msk.mxu0 %vm40_vm0, %v32_v0  ;;  %v15_v3 = vld [vmem:[%s430_s0] sm:$0xff] }
   0x3   :  { %246 = vmatpush3.xpose.msk.msra.mxu0 %vm40_vm0, %v32_v0  ;;  %277 = vmatprep.mubr.msk.f32.mxu0 %vm40_vm0, %v15_v3 }
   0x4   :  { %247 = vmatprep.subr.msk.mxu0 %vm40_vm0, %v31_v1 }
   0x7   :  { %248 = vmatpush3.xpose.msk.msra.mxu0 %vm40_vm0, %v31_v1 }
   0x8   :  { %8 = vsyncpa [#allocation3], 0  ;;  %249 = vmatprep.subr.msk.mxu0 %vm40_vm0, %v30_v2  ;;  %v29_v4 = vld [vmem:[%s431_s1 + $0x60] sm:$0xff]  ;;  %v28_v5 = vld [vmem:[%s431_s1 + $0x58] sm:$0xff] }
   0x9   :  { %v27_v6 = vld [vmem:[%s431_s1 + $0x50] sm:$0xff]  ;;  %v26_v7 = vld [vmem:[%s431_s1 + $0x48] sm:$0xff]  ;;  %v25_v8 = vld [vmem:[%s431_s1 + $0x40] sm:$0xff] }
   0xa   :  { %v24_v9 = vld [vmem:[%s431_s1 + $0x38] sm:$0xff]  ;;  %v23_v10 = vld [vmem:[%s431_s1 + $0x30] sm:$0xff]  ;;  %v22_v11 = vld [vmem:[%s431_s1 + $0x28] sm:$0xff] }
   0xb   :  { %250 = vmatpush3.xpose.msk.msra.mxu0 %vm40_vm0, %v30_v2  ;;  %v21_v12 = vld [vmem:[%s431_s1 + $0x20] sm:$0xff]  ;;  %v20_v13 = vld [vmem:[%s431_s1 + $0x18] sm:$0xff]  ;;  %v19_v14 = vld [vmem:[%s431_s1 + $0x10] sm:$0xff] }
   0xc   :  { %251 = vmatprep.subr.msk.mxu0 %vm40_vm0, %v29_v4  ;;  %v18_v15 = vld [vmem:[%s431_s1 + $0x8] sm:$0xff]  ;;  %v17_v16 = vld [vmem:[%s431_s1] sm:$0xff] }
   0xd   :  { %v16_v17 = vld [vmem:[%s430_s0 + $0x8] sm:$0xff]  ;;  %v208_v19 = vld [vmem:[%s432_s2] ss:$0 sm:$0xff]  ;;  %s313_s0 = smov [#allocation2]  }
   0xe   :  { %s197_s1 = sshll.u32 %s313_s0, 4  ;;  %s198_s1 = int_to_ptr.vmem [resolvable:$true] %s197_s1 }
   0xf   :  { %252 = vmatpush3.xpose.msk.msra.mxu0 %vm40_vm0, %v29_v4  ;;  %s291_s2 = scalar_lea.vmem %s198_s1, 256  ;;  %p296_p1 = scmp.lt.s32.totalorder %s198_s1, %s198_s1 }
  0x10   :  { %253 = vmatprep.subr.msk.mxu0 %vm40_vm0, %v28_v5  ;;  %p292_p0 = scmp.ne.s32.totalorder %s198_s1, %s291_s2  ;;  %p297_p2 = scmp.lt.s32.totalorder %s291_s2, %s291_s2 }
  0x12   :  { %p298_p3 = por %p297_p2, %p296_p1 }
  0x13   :  { %254 = vmatpush3.xpose.msk.msra.mxu0 %vm40_vm0, %v28_v5 }
  0x14   :  { %255 = vmatprep.subr.msk.mxu0 %vm40_vm0, %v27_v6  ;;  %p299_p4 = pnand %p298_p3, %p292_p0 }
  0x17   :  { %256 = vmatpush3.xpose.msk.msra.mxu0 %vm40_vm0, %v27_v6 }
  0x18   :  { %257 = vmatprep.subr.msk.mxu0 %vm40_vm0, %v26_v7 }
  0x1b   :  { %258 = vmatpush3.xpose.msk.msra.mxu0 %vm40_vm0, %v26_v7 }
  0x1c   :  { %259 = vmatprep.subr.msk.mxu0 %vm40_vm0, %v25_v8 }
  0x1f   :  { %260 = vmatpush3.xpose.msk.msra.mxu0 %vm40_vm0, %v25_v8 }
  0x20   :  { %261 = vmatprep.subr.msk.mxu0 %vm40_vm0, %v24_v9 }
  0x23   :  { %262 = vmatpush3.xpose.msk.msra.mxu0 %vm40_vm0, %v24_v9 }
  0x24   :  { %263 = vmatprep.subr.msk.mxu0 %vm40_vm0, %v23_v10 }
  0x27   :  { %264 = vmatpush3.xpose.msk.msra.mxu0 %vm40_vm0, %v23_v10 }
  0x28   :  { %265 = vmatprep.subr.msk.mxu0 %vm40_vm0, %v22_v11 }
  0x2b   :  { %266 = vmatpush3.xpose.msk.msra.mxu0 %vm40_vm0, %v22_v11 }
  0x2c   :  { %267 = vmatprep.subr.msk.mxu0 %vm40_vm0, %v21_v12 }
  0x2f   :  { %268 = vmatpush3.xpose.msk.msra.mxu0 %vm40_vm0, %v21_v12 }
  0x30   :  { %269 = vmatprep.subr.msk.mxu0 %vm40_vm0, %v20_v13 }
  0x33   :  { %270 = vmatpush3.xpose.msk.msra.mxu0 %vm40_vm0, %v20_v13 }
  0x34   :  { %271 = vmatprep.subr.msk.mxu0 %vm40_vm0, %v19_v14 }
  0x37   :  { %272 = vmatpush3.xpose.msk.msra.mxu0 %vm40_vm0, %v19_v14 }
  0x38   :  { %273 = vmatprep.subr.msk.mxu0 %vm40_vm0, %v18_v15 }
  0x3b   :  { %274 = vmatpush3.xpose.msk.msra.mxu0 %vm40_vm0, %v18_v15 }
  0x3c   :  { %275 = vmatprep.subr.msk.mxu0 %vm40_vm0, %v17_v16 }
  0x3f   :  { %276 = vmatpush3.xpose.msk.msra.mxu0 %vm40_vm0, %v17_v16 }
  0x42   :  { %278 = vmatmul.mubr.msk.f32.vlgmr.msra.gmra.mxu0 %vm40_vm0, %v16_v17 }
 0x102   :  { %v279_v18 = vpop.f32.mrf.mxu0 }
 0x103   :  { %v167_v22 = vadd.f32 %v279_v18, %v208_v19 }
 0x104   :  { %v161_v20 = vpop.f32.mrf.mxu0 }
 0x105   :  { %v162_v21 = vadd.f32 %v208_v19, %v161_v20 }
 0x107   :  { %170 = vmax.xlane.f32.xlu0 %v162_v21 }
 0x10b   :  { %172 = vmax.xlane.f32.xlu0 %v167_v22 }
 0x190   :  { %v171_v23 = vpop.xlane.xlu0 %170 }
 0x191   :  { %v174_v24 = vsub.f32 %v162_v21, %v171_v23 }
 0x193   :  { %v176_v25 = vmul.f32 1.442695, %v174_v24 }
 0x194   :  { %v173_v26 = vpop.xlane.xlu0 %172 }
 0x195   :  { %v175_v27 = vsub.f32 %v167_v22, %v173_v26  ;;  %283 = vpow2.f32 %v176_v25 }
 0x197   :  { %v178_v28 = vmul.f32 1.442695, %v175_v27 }
 0x199   :  { %285 = vpow2.f32 %v178_v28 }
 0x1a2   :  { %v284_v29 = vpop.eup %283 }
 0x1a3   :  { %180 = vadd.xlane.f32.xlu1 %v284_v29 }
 0x1a6   :  { %v286_v30 = vpop.eup %285 }
 0x1a7   :  { %182 = vadd.xlane.f32.xlu1 %v286_v30 }
 0x22c   :  { %v181_v31 = vpop.xlane.xlu1 %180 }
 0x22d   :  { %287 = vlog2.f32 %v181_v31 }
 0x230   :  { %v183_v32 = vpop.xlane.xlu1 %182 }
 0x231   :  { %289 = vlog2.f32 %v183_v32 }
 0x23a   :  { %v288_v33 = vpop.eup %287 }
 0x23b   :  { %v185_v34 = vmul.f32 0.6931472, %v288_v33 }
 0x23d   :  { %v188_v35 = vsub.f32 %v174_v24, %v185_v34 }
 0x23e   :  { %v290_v36 = vpop.eup %289 }
 0x23f   :  { %190 = vst [vmem:[#allocation2] sm:$0xff] %v188_v35  ;;  %v187_v37 = vmul.f32 0.6931472, %v290_v36 }
 0x241   :  { %v189_v38 = vsub.f32 %v175_v27, %v187_v37 }
 0x243   :  { %191 = vst [vmem:[#allocation2 + $0x8] sm:$0xff] %v189_v38 }
 0x244   :  { %302 = shalt.err (!%p299_p4)
}
 0x245   :  { %s314_s23 = smov 128   ;;  %s315_s24 = smov 8  }
 0x246   :  { %203 = dma.vmem_to_hbm [thread:$0]  %s198_s1, 256, %s433_s3, [#allocation3], %s314_s23, %s314_s23, %s315_s24  }
 0x247   :  { %311 = dma.done.wait [#allocation3], 256  }
 0x248   :  { %312 = vsyncadd [#allocation3], 4294967040 }
 0x249   :  { %207 = vsyncpa [#allocation3], 1 }

</bundles_post_ra>
